<compile_context>
chip_gen: v7x
topology: tpu7x:2x2x1
jax: 0.10.0
libtpu: 0.0.40
codegen_flags: <defaults>
</compile_context>

<pallas_src>
import functools
import math

import jax
import jax.numpy as jnp
from jax.experimental import pallas as pl
from jax.experimental.pallas import tpu as pltpu

EPS = 1e-6


def _round_up(a, b):
    return (a + b - 1) // b * b


def _choose_row_tile(R, requested):
    # Lane-dense tile: always a multiple of 128, capped at `requested`.
    tr = max(128, min(_round_up(requested, 128), _round_up(R, 128)))
    # Prefer >= 2 grid steps when there is enough work, so both v7x
    # TensorCores (via the "parallel" grid axis) get a share.
    if R > 128 and tr >= 256 and _round_up(R, tr) == tr:
        half = _round_up(tr // 2, 128)
        if half < tr:
            tr = half
    return tr


def _vn_leaky_relu_kernel(x_ref, w_ref, o_ref, *, negative_slope):
    # x_ref / o_ref: (D, C, TR) block — vector dim leading, channels on
    # sublanes, rows on lanes (lane-dense).  w_ref: (O, C) full weight.
    D = x_ref.shape[0]
    w = w_ref[...].astype(jnp.float32)                          # (O, C)

    # Single upcast; all intermediates stay f32 (exact MXU accumulation,
    # avoids bf16 VPU issues on v5e).  D is static -> plain Python unroll.
    xs = [x_ref[k].astype(jnp.float32) for k in range(D)]       # D x (C, TR)
    # Channel-mixing Linear, per vector component: d_k = W @ x_k -> (O, TR).
    ds = [jnp.dot(w, xk, preferred_element_type=jnp.float32) for xk in xs]

    # Reductions over the tiny vector dim: pure VPU adds, no cross-lane work.
    dotprod = xs[0] * ds[0]                                     # (C, TR)
    d_nsq = ds[0] * ds[0]                                       # (O, TR)
    for k in range(1, D):
        dotprod = dotprod + xs[k] * ds[k]
        d_nsq = d_nsq + ds[k] * ds[k]

    y = d_nsq + EPS
    inv = pl.reciprocal(y, approx=True)      # EUP slot, co-issues with VPU
    inv = inv * (2.0 - y * inv)              # 1 Newton step -> ~f32 accuracy

    # out = x - (1-ns) * where(dot >= 0, 0, dot/(|d|^2+eps)) * d
    coef = (1.0 - negative_slope) * jnp.where(
        dotprod >= 0.0, 0.0, dotprod * inv)                     # (C, TR)

    for k in range(D):
        o_ref[k] = (xs[k] - coef * ds[k]).astype(o_ref.dtype)


def vn_leaky_relu_dcr(x_dcr, w, *, negative_slope=0.01, row_tile=2048):
    """Core kernel on lane-dense layout.

    x_dcr: (D, C, R)  (vector-dim, channels, rows);  w: (O, C), O in {C, 1}.
    Use this entry point directly (no transposes) when the surrounding model
    keeps VN tensors in kernel layout.
    """
    D, C, R = x_dcr.shape
    O, Cw = w.shape
    assert Cw == C and O in (C, 1), (w.shape, C)

    tr = _choose_row_tile(R, row_tile)
    R_pad = _round_up(R, tr)
    x_p = x_dcr if R_pad == R else jnp.pad(
        x_dcr, ((0, 0), (0, 0), (0, R_pad - R)))

    kernel = functools.partial(_vn_leaky_relu_kernel,
                               negative_slope=float(negative_slope))

    out = pl.pallas_call(
        kernel,
        out_shape=jax.ShapeDtypeStruct((D, C, R_pad), x_dcr.dtype),
        grid_spec=pltpu.PrefetchScalarGridSpec(
            num_scalar_prefetch=0,
            grid=(R_pad // tr,),
            in_specs=[
                # If xprof ever shows exposed DMA on v7x, add
                # pipeline_mode=pl.Buffered(3) here.
                pl.BlockSpec((D, C, tr), lambda i: (0, 0, i)),
                pl.BlockSpec((O, C), lambda i: (0, 0)),
            ],
            out_specs=pl.BlockSpec((D, C, tr), lambda i: (0, 0, i)),
        ),
        compiler_params=pltpu.CompilerParams(
            dimension_semantics=("parallel",),
            vmem_limit_bytes=32 * 1024 * 1024,
        ),
    )(x_p, w)

    return out if R_pad == R else out[:, :, :R]


def vn_leaky_relu(x, w, negative_slope=0.01, row_tile=2048):
    """PyTorch-layout wrapper.  x: (..., C, D);  w: (O, C), O in {C, 1}.

    Boundary transposes only; prefer vn_leaky_relu_dcr() to avoid them when
    the model keeps VN tensors in (D, C, R) layout across layers.
    """
    C, D = x.shape[-2], x.shape[-1]
    lead = x.shape[:-2]
    R = math.prod(lead) if lead else 1

    x_dcr = jnp.transpose(x.reshape(R, C, D), (2, 1, 0))        # (D, C, R)
    out_dcr = vn_leaky_relu_dcr(x_dcr, w,
                                negative_slope=negative_slope,
                                row_tile=row_tile)
    return jnp.transpose(out_dcr, (2, 1, 0)).reshape(x.shape)


def vn_leaky_relu_ref(x, w, negative_slope=0.01):
    """Pure-JAX reference matching the PyTorch forward exactly."""
    d = jnp.einsum('...cv,oc->...ov', x, w)
    dotprod = jnp.sum(x * d, axis=-1, keepdims=True)
    mask = (dotprod >= 0).astype(x.dtype)
    d_norm_sq = jnp.sum(d * d, axis=-1, keepdims=True)
    ns = negative_slope
    return ns * x + (1 - ns) * (
        mask * x + (1 - mask) * (x - dotprod / (d_norm_sq + EPS) * d))


if __name__ == "__main__":
    key = jax.random.PRNGKey(0)
    kx, kw, kx2, kws = jax.random.split(key, 4)

    negative_slope = 0.01
    B, N, C, D = 2, 8, 32, 3          # x: (batch, points, in_channels, 3)

    x = jax.random.normal(kx, (B, N, C, D), dtype=jnp.float32)
    # deterministic Linear(C, C, bias=False) init (uniform +/- 1/sqrt(C))
    bound = 1.0 / jnp.sqrt(jnp.float32(C))
    w = jax.random.uniform(kw, (C, C), dtype=jnp.float32,
                           minval=-bound, maxval=bound)

    # Case 1: tiny input (single lane-dense 128-row block after padding),
    # share_nonlinearity=False (O == C).
    out = jax.block_until_ready(vn_leaky_relu(x, w, negative_slope))
    ref = vn_leaky_relu_ref(x, w, negative_slope)
    assert out.shape == x.shape
    # Tolerance 1e-4: approx-EUP reciprocal + Newton step (>= ~24-bit accurate).
    assert jnp.allclose(out, ref, atol=1e-4, rtol=1e-4), \
        float(jnp.max(jnp.abs(out - ref)))

    # Case 2: ragged row count -> exercises row zero-padding and a 2-step
    # "parallel" grid (both v7x TensorCores active).
    B2, N2 = 2, 600
    x2 = jax.random.normal(kx2, (B2, N2, C, D), dtype=jnp.float32)
    out2 = jax.block_until_ready(vn_leaky_relu(x2, w, negative_slope))
    ref2 = vn_leaky_relu_ref(x2, w, negative_slope)
    assert out2.shape == x2.shape
    assert jnp.allclose(out2, ref2, atol=1e-4, rtol=1e-4), \
        float(jnp.max(jnp.abs(out2 - ref2)))

    # Case 3: share_nonlinearity=True (O == 1) broadcast path.
    w_share = jax.random.uniform(kws, (1, C), dtype=jnp.float32,
                                 minval=-bound, maxval=bound)
    out3 = jax.block_until_ready(vn_leaky_relu(x, w_share, negative_slope))
    ref3 = vn_leaky_relu_ref(x, w_share, negative_slope)
    assert out3.shape == x.shape
    assert jnp.allclose(out3, ref3, atol=1e-4, rtol=1e-4), \
        float(jnp.max(jnp.abs(out3 - ref3)))

    print("KERNEL_OK")
</pallas_src>

<mosaic_0001>
module attributes {stable_mosaic.version = 11 : i64} {
  func.func @_vn_leaky_relu_kernel(%arg0: i32, %arg1: memref<3x32x128xf32, #tpu.memory_space<vmem>>, %arg2: memref<32x32xf32, #tpu.memory_space<vmem>>, %arg3: memref<3x32x128xf32, #tpu.memory_space<vmem>>) attributes {dimension_semantics = [#tpu.dimension_semantics<parallel>], iteration_bounds = array<i64: 1>, scalar_prefetch = 0 : i64, scratch_operands = 0 : i64, tpu.core_type = #tpu.core_type<tc>, window_params = [{transform_indices = @transform_0, window_bounds = array<i64: 3, 32, 128>}, {pipeline_mode = #tpu.pipeline_mode<synchronous>, transform_indices = @transform_1, window_bounds = array<i64: 32, 32>}, {transform_indices = @transform_2, window_bounds = array<i64: 3, 32, 128>}]} {
    %c0 = arith.constant 0 : index
    %c0_0 = arith.constant 0 : index
    %0 = vector.load %arg2[%c0, %c0_0] : memref<32x32xf32, #tpu.memory_space<vmem>>, vector<32x32xf32>
    %c0_1 = arith.constant 0 : index
    %c0_2 = arith.constant 0 : index
    %c0_3 = arith.constant 0 : index
    %1 = vector.load %arg1[%c0_1, %c0_2, %c0_3] : memref<3x32x128xf32, #tpu.memory_space<vmem>>, vector<1x32x128xf32>
    %2 = vector.shape_cast %1 : vector<1x32x128xf32> to vector<32x128xf32>
    %c1 = arith.constant 1 : index
    %c0_4 = arith.constant 0 : index
    %c0_5 = arith.constant 0 : index
    %3 = vector.load %arg1[%c1, %c0_4, %c0_5] : memref<3x32x128xf32, #tpu.memory_space<vmem>>, vector<1x32x128xf32>
    %4 = vector.shape_cast %3 : vector<1x32x128xf32> to vector<32x128xf32>
    %c2 = arith.constant 2 : index
    %c0_6 = arith.constant 0 : index
    %c0_7 = arith.constant 0 : index
    %5 = vector.load %arg1[%c2, %c0_6, %c0_7] : memref<3x32x128xf32, #tpu.memory_space<vmem>>, vector<1x32x128xf32>
    %6 = vector.shape_cast %5 : vector<1x32x128xf32> to vector<32x128xf32>
    %cst = arith.constant dense<0.000000e+00> : vector<32x128xf32>
    %7 = tpu.matmul %0, %2, %cst {dimension_numbers = #tpu.dot_dimension_numbers<[1], [0], [0], [1], [0, 0, 1, 1], [], []>} : vector<32x32xf32>, vector<32x128xf32>, vector<32x128xf32> -> vector<32x128xf32>
    %cst_8 = arith.constant dense<0.000000e+00> : vector<32x128xf32>
    %8 = tpu.matmul %0, %4, %cst_8 {dimension_numbers = #tpu.dot_dimension_numbers<[1], [0], [0], [1], [0, 0, 1, 1], [], []>} : vector<32x32xf32>, vector<32x128xf32>, vector<32x128xf32> -> vector<32x128xf32>
    %cst_9 = arith.constant dense<0.000000e+00> : vector<32x128xf32>
    %9 = tpu.matmul %0, %6, %cst_9 {dimension_numbers = #tpu.dot_dimension_numbers<[1], [0], [0], [1], [0, 0, 1, 1], [], []>} : vector<32x32xf32>, vector<32x128xf32>, vector<32x128xf32> -> vector<32x128xf32>
    %10 = arith.mulf %2, %7 : vector<32x128xf32>
    %11 = arith.mulf %7, %7 : vector<32x128xf32>
    %12 = arith.mulf %4, %8 : vector<32x128xf32>
    %13 = arith.addf %10, %12 : vector<32x128xf32>
    %14 = arith.mulf %8, %8 : vector<32x128xf32>
    %15 = arith.addf %11, %14 : vector<32x128xf32>
    %16 = arith.mulf %6, %9 : vector<32x128xf32>
    %17 = arith.addf %13, %16 : vector<32x128xf32>
    %18 = arith.mulf %9, %9 : vector<32x128xf32>
    %19 = arith.addf %15, %18 : vector<32x128xf32>
    %cst_10 = arith.constant 9.99999997E-7 : f32
    %20 = vector.broadcast %cst_10 : f32 to vector<32x128xf32>
    %21 = arith.addf %19, %20 : vector<32x128xf32>
    %22 = tpu.reciprocal %21 {approx = true} : vector<32x128xf32> -> vector<32x128xf32>
    %23 = arith.mulf %21, %22 : vector<32x128xf32>
    %cst_11 = arith.constant 2.000000e+00 : f32
    %24 = vector.broadcast %cst_11 : f32 to vector<32x128xf32>
    %25 = arith.subf %24, %23 : vector<32x128xf32>
    %26 = arith.mulf %22, %25 : vector<32x128xf32>
    %cst_12 = arith.constant 0.000000e+00 : f32
    %27 = vector.broadcast %cst_12 : f32 to vector<32x128xf32>
    %28 = arith.cmpf oge, %17, %27 : vector<32x128xf32>
    %29 = arith.mulf %17, %26 : vector<32x128xf32>
    %cst_13 = arith.constant 0.000000e+00 : f32
    %30 = vector.broadcast %cst_13 : f32 to vector<32x128xf32>
    %31 = arith.select %28, %30, %29 : vector<32x128xi1>, vector<32x128xf32>
    %cst_14 = arith.constant 9.900000e-01 : f32
    %32 = vector.broadcast %cst_14 : f32 to vector<32x128xf32>
    %33 = arith.mulf %32, %31 : vector<32x128xf32>
    %34 = arith.mulf %33, %7 : vector<32x128xf32>
    %35 = arith.subf %2, %34 : vector<32x128xf32>
    %c0_15 = arith.constant 0 : index
    %c0_16 = arith.constant 0 : index
    %c0_17 = arith.constant 0 : index
    %36 = vector.load %arg3[%c0_15, %c0_16, %c0_17] : memref<3x32x128xf32, #tpu.memory_space<vmem>>, vector<1x32x128xf32>
    %37 = vector.shape_cast %36 : vector<1x32x128xf32> to vector<32x128xf32>
    %38 = vector.shape_cast %35 : vector<32x128xf32> to vector<1x32x128xf32>
    tpu.vector_store %arg3[%c0_15, %c0_16, %c0_17], %38 {strides = array<i32>} : memref<3x32x128xf32, #tpu.memory_space<vmem>>, vector<1x32x128xf32>,
    %39 = arith.mulf %33, %8 : vector<32x128xf32>
    %40 = arith.subf %4, %39 : vector<32x128xf32>
    %c1_18 = arith.constant 1 : index
    %c0_19 = arith.constant 0 : index
    %c0_20 = arith.constant 0 : index
    %41 = vector.load %arg3[%c1_18, %c0_19, %c0_20] : memref<3x32x128xf32, #tpu.memory_space<vmem>>, vector<1x32x128xf32>
    %42 = vector.shape_cast %41 : vector<1x32x128xf32> to vector<32x128xf32>
    %43 = vector.shape_cast %40 : vector<32x128xf32> to vector<1x32x128xf32>
    tpu.vector_store %arg3[%c1_18, %c0_19, %c0_20], %43 {strides = array<i32>} : memref<3x32x128xf32, #tpu.memory_space<vmem>>, vector<1x32x128xf32>,
    %44 = arith.mulf %33, %9 : vector<32x128xf32>
    %45 = arith.subf %6, %44 : vector<32x128xf32>
    %c2_21 = arith.constant 2 : index
    %c0_22 = arith.constant 0 : index
    %c0_23 = arith.constant 0 : index
    %46 = vector.load %arg3[%c2_21, %c0_22, %c0_23] : memref<3x32x128xf32, #tpu.memory_space<vmem>>, vector<1x32x128xf32>
    %47 = vector.shape_cast %46 : vector<1x32x128xf32> to vector<32x128xf32>
    %48 = vector.shape_cast %45 : vector<32x128xf32> to vector<1x32x128xf32>
    tpu.vector_store %arg3[%c2_21, %c0_22, %c0_23], %48 {strides = array<i32>} : memref<3x32x128xf32, #tpu.memory_space<vmem>>, vector<1x32x128xf32>,
    return
  }
  func.func @transform_0(%arg0: i32) -> (i32, i32, i32) {
    %c0_i32 = arith.constant 0 : i32
    %c0_i32_0 = arith.constant 0 : i32
    %c0_i32_1 = arith.constant 0 : i32
    return %c0_i32, %c0_i32_0, %arg0 : i32, i32, i32
  }
  func.func @transform_1(%arg0: i32) -> (i32, i32) {
    %c0_i32 = arith.constant 0 : i32
    %c0_i32_0 = arith.constant 0 : i32
    %c0_i32_1 = arith.constant 0 : i32
    return %c0_i32, %c0_i32_0 : i32, i32
  }
  func.func @transform_2(%arg0: i32) -> (i32, i32, i32) {
    %c0_i32 = arith.constant 0 : i32
    %c0_i32_0 = arith.constant 0 : i32
    %c0_i32_1 = arith.constant 0 : i32
    return %c0_i32, %c0_i32_0, %arg0 : i32, i32, i32
  }
}

</mosaic_0001>

<bundles_post_ra>
// kernel: tpu_custom_call.1
= control target key start
LH: loop header
LB: loop body
LE: loop exit
PB: predicated region body
PF: predicated region fallthrough
CT: control target
= control target key end

     0   :  { %7 = vsyncpa [#allocation3], 0  ;;  %s846_s0 = inlined_call_operand.hbm [shape: f32[3,32,128], index: 0, kind: input, shape index: {}]   ;;  %s847_s1 = inlined_call_operand.hbm [shape: f32[32,32], index: 1, kind: input, shape index: {}]   ;;  %s848_s2 = inlined_call_operand.hbm [shape: f32[3,32,128], index: 2, kind: output, shape index: {}]  }
   0x1   :  { %8 = vsyncpa [#allocation6], 0 }
   0x2   :  { %9 = vsyncpa [#allocation4], 0  ;;  %s649_s9 = smov [#allocation2]   ;;  %s577_s13 = scalar_lea.hbm %s846_s0, 1536 }
   0x3   :  { %s15_s10 = sshll.u32 %s649_s9, 4  ;;  %p578_p0 = scmp.ne.s32.totalorder %s846_s0, %s577_s13  ;;  %s16_s10 = int_to_ptr.vmem [resolvable:$true] %s15_s10 }
   0x4   :  { %p581_p1 = scmp.lt.u32.totalorder %s577_s13, %s846_s0 }
   0x6   :  { %p583_p2 = pnand %p581_p1, %p578_p0 }
   0x8   :  { %586 = shalt.err (!%p583_p2)
}
   0x9   :  { %s587_s18 = scalar_lea.vmem %s16_s10, 1536  ;;  %p592_p4 = scmp.lt.s32.totalorder %s16_s10, %s16_s10 }
   0xa   :  { %p588_p3 = scmp.ne.s32.totalorder %s16_s10, %s587_s18  ;;  %p593_p5 = scmp.lt.s32.totalorder %s587_s18, %s587_s18 }
   0xc   :  { %p594_p6 = por %p593_p5, %p592_p4 }
   0xe   :  { %p595_p7 = pnand %p594_p6, %p588_p3 }
  0x10   :  { %598 = shalt.err (!%p595_p7)
}
  0x11   :  { %s650_s19 = smov 128   ;;  %s651_s20 = smov 8  }
  0x12   :  { %21 = dma.hbm_to_vmem [thread:$0]  %s846_s0, 1536, %s16_s10, [#allocation3], %s650_s19, %s650_s19, %s651_s20  }
  0x13   :  { %s652_s23 = smov [#allocation5]   ;;  %s599_s27 = scalar_lea.hbm %s847_s1, 512 }
  0x14   :  { %s27_s24 = sshll.u32 %s652_s23, 4  ;;  %p600_p8 = scmp.ne.s32.totalorder %s847_s1, %s599_s27  ;;  %s28_s24 = int_to_ptr.vmem [resolvable:$true] %s27_s24 }
  0x15   :  { %p603_p9 = scmp.lt.u32.totalorder %s599_s27, %s847_s1 }
  0x17   :  { %p605_p10 = pnand %p603_p9, %p600_p8 }
  0x19   :  { %608 = shalt.err (!%p605_p10)
}
  0x1a   :  { %s609_s4 = scalar_lea.vmem %s28_s24, 512  ;;  %p614_p12 = scmp.lt.s32.totalorder %s28_s24, %s28_s24 }
  0x1b   :  { %p610_p11 = scmp.ne.s32.totalorder %s28_s24, %s609_s4  ;;  %p615_p13 = scmp.lt.s32.totalorder %s609_s4, %s609_s4 }
  0x1d   :  { %p616_p0 = por %p615_p13, %p614_p12 }
  0x1f   :  { %p617_p1 = pnand %p616_p0, %p610_p11 }
  0x21   :  { %620 = shalt.err (!%p617_p1)
}
  0x22   :  { %33 = dma.hbm_to_vmem [thread:$0]  %s847_s1, 512, %s28_s24, [#allocation6], %s650_s19, %s650_s19, %s651_s20  }
  0x23   :  { %643 = dma.done.wait [#allocation3], 1536  }
  0x24   :  { %644 = vsyncadd [#allocation3], 4294965760 }
  0x25   :  { %645 = dma.done.wait [#allocation6], 512  }
  0x26   :  { %646 = vsyncadd [#allocation6], 4294966784  ;;  %v699_v0 = vld [vmem:[#allocation2] sm:$0xff]  ;;  %v701_v1 = vld [vmem:[#allocation2 + $0x8] sm:$0xff]  ;;  %vm58_vm0 = vcmask 261120   ;;  %s653_s1 = smov [#allocation7]  }
  0x27   :  { %v703_v2 = vld [vmem:[#allocation2 + $0x20] sm:$0xff]  ;;  %v536_v3 = vpack.c.bf16 %v701_v1, %v699_v0  ;;  %v707_v4 = vld [vmem:[#allocation2 + $0x28] sm:$0xff]  ;;  %v709_v5 = vld [vmem:[#allocation2 + $0x10] sm:$0xff]  ;;  %s445_s6 = sshll.u32 %s653_s1, 4  ;;  %s446_s6 = int_to_ptr.vmem [resolvable:$true] %s445_s6 }
  0x28   :  { %v711_v6 = vld [vmem:[#allocation2 + $0x18] sm:$0xff]  ;;  %v544_v7 = vpack.c.bf16 %v707_v4, %v703_v2  ;;  %v717_v9 = vld [vmem:[#allocation2 + $0x30] sm:$0xff]  ;;  %v40_v11 = vld [vmem:[#allocation5] sm:$0xff]  ;;  %s621_s7 = scalar_lea.vmem %s446_s6, 1536  ;;  %p626_p3 = scmp.lt.s32.totalorder %s446_s6, %s446_s6 }
  0x29   :  { %v540_v8 = vpack.c.bf16 %v711_v6, %v709_v5  ;;  %v719_v10 = vld [vmem:[#allocation2 + $0x38] sm:$0xff]  ;;  %537 = vmatprep.subr.bf16.mxu0 %v536_v3  ;;  %502 = vmatprep.mubr.msk.f32.mxu0 %vm58_vm0, %v40_v11  ;;  %v724_v13 = vld [vmem:[#allocation2 + $0x40] sm:$0xff]  ;;  %v726_v14 = vld [vmem:[#allocation2 + $0x48] sm:$0xff]  ;;  %p622_p2 = scmp.ne.s32.totalorder %s446_s6, %s621_s7  ;;  %p627_p4 = scmp.lt.s32.totalorder %s621_s7, %s621_s7 }
  0x2a   :  { %v548_v12 = vpack.c.bf16 %v719_v10, %v717_v9  ;;  %545 = vmatprep.subr.bf16.mxu1 %v544_v7  ;;  %539 = vmatpush3.bf16.msra.mxu0 %v536_v3  ;;  %v552_v15 = vpack.c.bf16 %v726_v14, %v724_v13  ;;  %v731_v16 = vld [vmem:[#allocation2 + $0x50] sm:$0xff]  ;;  %v733_v17 = vld [vmem:[#allocation2 + $0x58] sm:$0xff]  ;;  %v41_v18 = vld [vmem:[#allocation5 + $0x8] sm:$0xff] }
  0x2b   :  { %547 = vmatpush3.bf16.msra.mxu1 %v544_v7  ;;  %541 = vmatprep.subr.bf16.mxu0 %v540_v8  ;;  %v42_v19 = vld [vmem:[#allocation5 + $0x10] sm:$0xff]  ;;  %v556_v20 = vpack.c.bf16 %v733_v17, %v731_v16  ;;  %v43_v21 = vld [vmem:[#allocation5 + $0x18] sm:$0xff]  ;;  %p628_p5 = por %p627_p4, %p626_p3 }
  0x2c   :  { %549 = vmatprep.subr.bf16.mxu1 %v548_v12  ;;  %516 = vmatprep.mubr.msk.f32.mxu1 %vm58_vm0, %v40_v11 }
  0x2d   :  { %p629_p6 = pnand %p628_p5, %p622_p2 }
  0x2e   :  { %543 = vmatpush3.bf16.msra.mxu0 %v540_v8 }
  0x2f   :  { %551 = vmatpush3.bf16.msra.mxu1 %v548_v12  ;;  %553 = vmatprep.subr.bf16.mxu0 %v552_v15 }
  0x30   :  { %560 = vmatprep.subr.bf16.mxu1 %v552_v15 }
  0x31   :  { %503 = vmatmul.mubr.msk.f32.vlgmr.msra.gmra.mrb[0].mxu0 %vm58_vm0, %v41_v18 }
  0x32   :  { %517 = vmatmul.mubr.msk.f32.vlgmr.msra.gmra.mrb[0].mxu1 %vm58_vm0, %v41_v18  ;;  %555 = vmatpush3.bf16.msra.mxu0 %v552_v15 }
  0x33   :  { %562 = vmatpush3.bf16.msra.mxu1 %v552_v15  ;;  %505 = vmatprep.mubr.msk.f32.mxu0 %vm58_vm0, %v42_v19 }
  0x34   :  { %519 = vmatprep.mubr.msk.f32.mxu1 %vm58_vm0, %v42_v19  ;;  %557 = vmatprep.subr.bf16.mxu0 %v556_v20 }
  0x35   :  { %506 = vmatmul.mubr.msk.f32.gmra.mrb[2].mxu0 %vm58_vm0, %v43_v21  ;;  %561 = vmatprep.subr.bf16.mxu1 %v556_v20 }
  0x36   :  { %520 = vmatmul.mubr.msk.f32.gmra.mrb[2].mxu1 %vm58_vm0, %v43_v21  ;;  %559 = vmatpush3.bf16.msra.mxu0 %v556_v20 }
  0x37   :  { %563 = vmatpush3.bf16.msra.mxu1 %v556_v20  ;;  %530 = vmatprep.mubr.msk.f32.mxu0 %vm58_vm0, %v40_v11 }
  0x38   :  { %533 = vmatprep.mubr.msk.f32.mxu1 %vm58_vm0, %v42_v19 }
  0x39   :  { %531 = vmatmul.mubr.msk.f32.vlgmr.msra.gmra.mrb[4].mxu0 %vm58_vm0, %v41_v18 }
  0x3a   :  { %534 = vmatmul.mubr.msk.f32.vlgmr.msra.gmra.mrb[4].mxu1 %vm58_vm0, %v43_v21 }
 0x104   :  { %v747_v22 = vpop.f32.mrb[0].mxu0 }
 0x105   :  { %v327_v23 = vmul.f32 %v747_v22, %v701_v1  ;;  %v331_v24 = vmul.f32 %v747_v22, %v747_v22  ;;  %v753_v25 = vpop.f32.mrb[0].mxu1  ;;  %v755_v26 = vpop.f32.mrb[1].mxu0 }
 0x106   :  { %v335_v27 = vmul.f32 %v753_v25, %v707_v4  ;;  %v343_v28 = vmul.f32 %v753_v25, %v753_v25  ;;  %v326_v29 = vmul.f32 %v755_v26, %v699_v0  ;;  %v330_v30 = vmul.f32 %v755_v26, %v755_v26  ;;  %v765_v31 = vpop.f32.mrb[1].mxu1 }
 0x107   :  { %v334_v32 = vmul.f32 %v765_v31, %v703_v2  ;;  %v342_v33 = vmul.f32 %v765_v31, %v765_v31 }
 0x108   :  { %v339_v34 = vadd.f32 %v335_v27, %v327_v23  ;;  %v347_v35 = vadd.f32 %v343_v28, %v331_v24  ;;  %v771_v36 = vpop.f32.mrb[2].mxu0 }
 0x109   :  { %v338_v37 = vadd.f32 %v334_v32, %v326_v29  ;;  %v346_v38 = vadd.f32 %v342_v33, %v330_v30  ;;  %v329_v39 = vmul.f32 %v771_v36, %v711_v6  ;;  %v333_v40 = vmul.f32 %v771_v36, %v771_v36  ;;  %v777_v41 = vpop.f32.mrb[2].mxu1  ;;  %v779_v42 = vpop.f32.mrb[3].mxu0 }
 0x10a   :  { %v337_v43 = vmul.f32 %v777_v41, %v719_v10  ;;  %v345_v44 = vmul.f32 %v777_v41, %v777_v41  ;;  %v328_v45 = vmul.f32 %v779_v42, %v709_v5  ;;  %v332_v46 = vmul.f32 %v779_v42, %v779_v42  ;;  %v789_v47 = vpop.f32.mrb[3].mxu1 }
 0x10b   :  { %v336_v48 = vmul.f32 %v789_v47, %v717_v9  ;;  %v344_v49 = vmul.f32 %v789_v47, %v789_v47 }
 0x10c   :  { %v341_v50 = vadd.f32 %v337_v43, %v329_v39  ;;  %v349_v51 = vadd.f32 %v345_v44, %v333_v40  ;;  %v532_v52 = vpop.f32.mrb[4].mxu0 }
 0x10d   :  { %v340_v53 = vadd.f32 %v336_v48, %v328_v45  ;;  %v348_v54 = vadd.f32 %v344_v49, %v332_v46  ;;  %v351_v55 = vmul.f32 %v532_v52, %v726_v14  ;;  %v359_v56 = vmul.f32 %v532_v52, %v532_v52  ;;  %v535_v57 = vpop.f32.mrb[4].mxu1  ;;  %v796_v58 = vpop.f32.mrb[5].mxu0 }
 0x10e   :  { %v353_v59 = vmul.f32 %v535_v57, %v733_v17  ;;  %v361_v60 = vmul.f32 %v535_v57, %v535_v57  ;;  %v350_v61 = vmul.f32 %v796_v58, %v724_v13  ;;  %v358_v62 = vmul.f32 %v796_v58, %v796_v58  ;;  %v803_v63 = vpop.f32.mrb[5].mxu1 }
 0x10f   :  { %v355_v3 = vadd.f32 %v351_v55, %v339_v34  ;;  %v363_v7 = vadd.f32 %v359_v56, %v347_v35  ;;  %v352_v8 = vmul.f32 %v803_v63, %v731_v16  ;;  %v360_v11 = vmul.f32 %v803_v63, %v803_v63 }
 0x110   :  { %v357_v12 = vadd.f32 %v353_v59, %v341_v50  ;;  %v365_v15 = vadd.f32 %v361_v60, %v349_v51  ;;  %v354_v18 = vadd.f32 %v350_v61, %v338_v37  ;;  %v362_v19 = vadd.f32 %v358_v62, %v346_v38 }
 0x111   :  { %v367_v20 = vadd.f32 1e-06, %v363_v7  ;;  %v356_v21 = vadd.f32 %v352_v8, %v340_v53  ;;  %v364_v23 = vadd.f32 %v360_v11, %v348_v54  ;;  %vm387_vm1 = vcmp.ge.f32.partialorder %v355_v3, 0.0 }
 0x112   :  { %v369_v24 = vadd.f32 1e-06, %v365_v15  ;;  %v366_v27 = vadd.f32 1e-06, %v362_v19  ;;  %vm389_vm2 = vcmp.ge.f32.partialorder %v357_v12, 0.0  ;;  %vm386_vm3 = vcmp.ge.f32.partialorder %v354_v18, 0.0 }
 0x113   :  { %569 = vrcp.f32 %v367_v20  ;;  %v368_v28 = vadd.f32 1e-06, %v364_v23  ;;  %vm388_vm4 = vcmp.ge.f32.partialorder %v356_v21, 0.0 }
 0x114   :  { %571 = vrcp.f32 %v369_v24 }
 0x115   :  { %573 = vrcp.f32 %v366_v27 }
 0x116   :  { %575 = vrcp.f32 %v368_v28 }
 0x11d   :  { %v570_v29 = vpop.eup %569 }
 0x11e   :  { %v572_v30 = vpop.eup %571  ;;  %v375_v32 = vmul.f32 %v570_v29, %v367_v20 }
 0x11f   :  { %v574_v33 = vpop.eup %573  ;;  %v377_v34 = vmul.f32 %v572_v30, %v369_v24 }
 0x120   :  { %v576_v35 = vpop.eup %575  ;;  %v379_v39 = vsub.f32 2.0, %v375_v32  ;;  %v374_v40 = vmul.f32 %v574_v33, %v366_v27 }
 0x121   :  { %v381_v37 = vsub.f32 2.0, %v377_v34  ;;  %v376_v38 = vmul.f32 %v576_v35, %v368_v28 }
 0x122   :  { %v383_v43 = vmul.f32 %v570_v29, %v379_v39  ;;  %v378_v44 = vsub.f32 2.0, %v374_v40 }
 0x123   :  { %v385_v45 = vmul.f32 %v572_v30, %v381_v37  ;;  %v380_v46 = vsub.f32 2.0, %v376_v38 }
 0x124   :  { %v391_v48 = vmul.f32 %v383_v43, %v355_v3  ;;  %v382_v49 = vmul.f32 %v574_v33, %v378_v44 }
 0x125   :  { %v393_v50 = vmul.f32 %v385_v45, %v357_v12  ;;  %v384_v51 = vmul.f32 %v576_v35, %v380_v46 }
 0x126   :  { %v395_v53 = vsel %vm387_vm1, 0.0, %v391_v48  ;;  %v390_v54 = vmul.f32 %v382_v49, %v354_v18 }
 0x127   :  { %v399_v55 = vmul.f32 0.99, %v395_v53  ;;  %v397_v56 = vsel %vm389_vm2, 0.0, %v393_v50  ;;  %v392_v59 = vmul.f32 %v384_v51, %v356_v21 }
 0x128   :  { %v401_v60 = vmul.f32 0.99, %v397_v56  ;;  %v394_v61 = vsel %vm386_vm3, 0.0, %v390_v54 }
 0x129   :  { %v403_v62 = vmul.f32 %v747_v22, %v399_v55  ;;  %v415_v7 = vmul.f32 %v753_v25, %v399_v55  ;;  %v428_v8 = vmul.f32 %v532_v52, %v399_v55  ;;  %v398_v11 = vmul.f32 0.99, %v394_v61 }
 0x12a   :  { %v405_v3 = vmul.f32 %v771_v36, %v401_v60  ;;  %v417_v15 = vmul.f32 %v777_v41, %v401_v60  ;;  %v430_v19 = vmul.f32 %v535_v57, %v401_v60  ;;  %v396_v12 = vsel %vm388_vm4, 0.0, %v392_v59 }
 0x12b   :  { %v407_v20 = vsub.f32 %v701_v1, %v403_v62  ;;  %v419_v18 = vsub.f32 %v707_v4, %v415_v7  ;;  %v432_v23 = vsub.f32 %v726_v14, %v428_v8  ;;  %v402_v21 = vmul.f32 %v398_v11, %v755_v26 }
 0x12c   :  { %v409_v22 = vsub.f32 %v711_v6, %v405_v3  ;;  %v421_v25 = vsub.f32 %v719_v10, %v417_v15  ;;  %v434_v52 = vsub.f32 %v733_v17, %v430_v19  ;;  %v414_v36 = vmul.f32 %v398_v11, %v765_v31 }
 0x12d   :  { %411 = vst [vmem:[#allocation7 + $0x8] sm:$0xff] %v407_v20  ;;  %424 = vst [vmem:[#allocation7 + $0x28] sm:$0xff] %v419_v18  ;;  %v406_v41 = vsub.f32 %v699_v0, %v402_v21  ;;  %v427_v1 = vmul.f32 %v398_v11, %v796_v58  ;;  %v400_v4 = vmul.f32 0.99, %v396_v12 }
 0x12e   :  { %437 = vst [vmem:[#allocation7 + $0x48] sm:$0xff] %v432_v23  ;;  %413 = vst [vmem:[#allocation7 + $0x18] sm:$0xff] %v409_v22  ;;  %v418_v14 = vsub.f32 %v703_v2, %v414_v36 }
 0x12f   :  { %426 = vst [vmem:[#allocation7 + $0x38] sm:$0xff] %v421_v25  ;;  %439 = vst [vmem:[#allocation7 + $0x58] sm:$0xff] %v434_v52  ;;  %v431_v6 = vsub.f32 %v724_v13, %v427_v1  ;;  %v404_v10 = vmul.f32 %v400_v4, %v779_v42  ;;  %v416_v17 = vmul.f32 %v400_v4, %v789_v47 }
 0x130   :  { %410 = vst [vmem:[#allocation7] sm:$0xff] %v406_v41  ;;  %v429_v26 = vmul.f32 %v400_v4, %v803_v63  ;;  %423 = vst [vmem:[#allocation7 + $0x20] sm:$0xff] %v418_v14 }
 0x131   :  { %436 = vst [vmem:[#allocation7 + $0x40] sm:$0xff] %v431_v6  ;;  %v408_v0 = vsub.f32 %v709_v5, %v404_v10  ;;  %v420_v31 = vsub.f32 %v717_v9, %v416_v17 }
 0x132   :  { %v433_v57 = vsub.f32 %v731_v16, %v429_v26 }
 0x133   :  { %412 = vst [vmem:[#allocation7 + $0x10] sm:$0xff] %v408_v0  ;;  %425 = vst [vmem:[#allocation7 + $0x30] sm:$0xff] %v420_v31 }
 0x134   :  { %438 = vst [vmem:[#allocation7 + $0x50] sm:$0xff] %v433_v57 }
 0x135   :  { %632 = shalt.err (!%p629_p6)
}
 0x136   :  { %s633_s10 = scalar_lea.hbm %s848_s2, 1536 }
 0x137   :  { %p634_p7 = scmp.ne.s32.totalorder %s848_s2, %s633_s10  ;;  %p637_p8 = scmp.lt.u32.totalorder %s633_s10, %s848_s2 }
 0x139   :  { %p639_p9 = pnand %p637_p8, %p634_p7 }
 0x13b   :  { %642 = shalt.err (!%p639_p9)
}
 0x13c   :  { %451 = dma.vmem_to_hbm [thread:$0]  %s446_s6, 1536, %s848_s2, [#allocation4], %s650_s19, %s650_s19, %s651_s20  }
 0x13d   :  { %647 = dma.done.wait [#allocation4], 1536  }
 0x13e   :  { %648 = vsyncadd [#allocation4], 4294965760 }
 0x13f   :  { %455 = vsyncpa [#allocation3], 1 }
 0x140   :  { %456 = vsyncpa [#allocation6], 1 }
 0x141   :  { %457 = vsyncpa [#allocation4], 1 }

</bundles_post_ra>
